<compile_context>
chip_gen: v5e
topology: v5e:2x2
jax: 0.10.0
libtpu: 0.0.40
codegen_flags: <defaults>
</compile_context>

<pallas_src>
import functools
import math

import jax
import jax.numpy as jnp
import numpy as np
from jax.experimental import pallas as pl
from jax.experimental.pallas import tpu as pltpu


def make_positional_encoding_table(d_model, max_len=1001, dtype=jnp.float32):
    """Deterministic parameter setup identical to the PyTorch __init__."""
    pe = np.zeros((max_len, d_model), dtype=np.float32)
    position = np.arange(0, max_len, dtype=np.float32)[:, None]
    div_term = np.exp(np.arange(0, d_model, 2, dtype=np.float32)
                      * (-math.log(10000.0) / d_model))
    pe[:, 0::2] = np.sin(position * div_term)
    pe[:, 1::2] = np.cos(position * div_term)
    # PyTorch stores (max_len, 1, d_model); we keep the squeezed (max_len, d_model)
    # and broadcast over batch inside the kernel.
    return jnp.asarray(pe, dtype=dtype)


def _broadcast_pe(pe, n_rep):
    # (TS, D) -> (TS, n_rep*D): lane-dim replication matching x.reshape(S, B*D)
    # where flat index = b*D + d.
    if n_rep > 1:
        pe = jnp.concatenate([pe] * n_rep, axis=-1)
    return pe


def _pe_kernel(x_ref, pe_ref, o_ref, *, n_rep):
    pe = _broadcast_pe(pe_ref[...], n_rep)
    y = x_ref[...].astype(jnp.float32) + pe.astype(jnp.float32)
    o_ref[...] = y.astype(o_ref.dtype)


def _pe_dropout_kernel(x_ref, pe_ref, mask_ref, o_ref, *, n_rep):
    pe = _broadcast_pe(pe_ref[...], n_rep)
    y = x_ref[...].astype(jnp.float32) + pe.astype(jnp.float32)
    # mask holds pre-scaled values {0, 1/(1-p)} -> single VPU multiply.
    o_ref[...] = (y * mask_ref[...]).astype(o_ref.dtype)


def _pick_seq_tile(S, row_bytes, target_bytes=2 * 1024 * 1024):
    """~2 MiB x-blocks, second-minor dim a multiple of 8 (or the full S)."""
    ts = target_bytes // max(1, row_bytes)
    ts = (ts // 8) * 8
    ts = max(8, ts)
    if ts >= S:
        return S
    return ts


def positional_encoding_forward(x, pe_table, *, p=0.1, training=False, rng_key=None):
    """x: (seq_len, batch, d_model). Returns same shape/dtype."""
    S, B, D = x.shape
    BD = B * D

    # Lane-dense 2-D view: minor dim = B*D (layout plumbing only, no copy).
    x2 = x.reshape(S, BD)
    pe_slice = pe_table[:S, :]                     # (S, D) == pe[:x.size(0)] squeezed

    ts = _pick_seq_tile(S, BD * jnp.dtype(x.dtype).itemsize)
    grid = (pl.cdiv(S, ts),)

    x_spec = pl.BlockSpec((ts, BD), lambda i: (i, 0))
    pe_spec = pl.BlockSpec((ts, D), lambda i: (i, 0))
    out_spec = pl.BlockSpec((ts, BD), lambda i: (i, 0))

    compiler_params = pltpu.CompilerParams(
        dimension_semantics=("parallel",),         # shards across TCs on v7x
    )
    out_shape = jax.ShapeDtypeStruct((S, BD), x.dtype)

    if training and p > 0.0:
        if rng_key is None:
            rng_key = jax.random.PRNGKey(0)
        keep = jax.random.bernoulli(rng_key, 1.0 - float(p), (S, BD))
        mask = jnp.where(keep,
                         jnp.float32(1.0 / (1.0 - float(p))),
                         jnp.float32(0.0))
        kernel = functools.partial(_pe_dropout_kernel, n_rep=B)
        out2 = pl.pallas_call(
            kernel,
            out_shape=out_shape,
            grid_spec=pltpu.PrefetchScalarGridSpec(
                num_scalar_prefetch=0,
                grid=grid,
                in_specs=[x_spec, pe_spec,
                          pl.BlockSpec((ts, BD), lambda i: (i, 0))],
                out_specs=out_spec),
            compiler_params=compiler_params,
        )(x2, pe_slice, mask)
    else:
        kernel = functools.partial(_pe_kernel, n_rep=B)
        out2 = pl.pallas_call(
            kernel,
            out_shape=out_shape,
            grid_spec=pltpu.PrefetchScalarGridSpec(
                num_scalar_prefetch=0,
                grid=grid,
                in_specs=[x_spec, pe_spec],
                out_specs=out_spec),
            compiler_params=compiler_params,
        )(x2, pe_slice)

    return out2.reshape(S, B, D)


if __name__ == "__main__":
    # Small shapes consistent with the module: seq=8, batch=2, d_model=32.
    S, B, D = 8, 2, 32
    key = jax.random.PRNGKey(0)
    kx, kdrop = jax.random.split(key)
    x = jax.random.normal(kx, (S, B, D), dtype=jnp.float32)

    pe_table = make_positional_encoding_table(d_model=D, max_len=1001)

    # Eval mode (dropout = identity): exact numerical check vs pure-JAX reference.
    out_eval = positional_encoding_forward(x, pe_table, p=0.1, training=False)
    out_eval = jax.block_until_ready(out_eval)
    ref = x + pe_table[:S, :][:, None, :]
    np.testing.assert_allclose(np.asarray(out_eval), np.asarray(ref),
                               rtol=1e-6, atol=1e-6)

    # Training mode: inverted dropout applied inside the kernel.
    out_train = positional_encoding_forward(x, pe_table, p=0.1, training=True,
                                            rng_key=kdrop)
    out_train = jax.block_until_ready(out_train)
    assert out_train.shape == x.shape and out_train.dtype == x.dtype
    # Every surviving element equals ref / (1-p); dropped elements are 0.
    scaled_ref = np.asarray(ref) / (1.0 - 0.1)
    ot = np.asarray(out_train)
    kept = ot != 0.0
    np.testing.assert_allclose(ot[kept], scaled_ref[kept], rtol=1e-5, atol=1e-5)

    print("KERNEL_OK")
</pallas_src>

<mosaic_0001>
module attributes {stable_mosaic.version = 11 : i64} {
  func.func @_pe_kernel(%arg0: i32, %arg1: memref<8x64xf32, #tpu.memory_space<vmem>>, %arg2: memref<8x32xf32, #tpu.memory_space<vmem>>, %arg3: memref<8x64xf32, #tpu.memory_space<vmem>>) attributes {dimension_semantics = [#tpu.dimension_semantics<parallel>], iteration_bounds = array<i64: 1>, scalar_prefetch = 0 : i64, scratch_operands = 0 : i64, tpu.core_type = #tpu.core_type<tc>, window_params = [{transform_indices = @transform_0, window_bounds = array<i64: 8, 64>}, {transform_indices = @transform_1, window_bounds = array<i64: 8, 32>}, {transform_indices = @transform_2, window_bounds = array<i64: 8, 64>}]} {
    %c0 = arith.constant 0 : index
    %c0_0 = arith.constant 0 : index
    %0 = vector.load %arg2[%c0, %c0_0] : memref<8x32xf32, #tpu.memory_space<vmem>>, vector<8x32xf32>
    %1 = tpu.concatenate %0, %0 in 1 : vector<8x32xf32>, vector<8x32xf32> -> vector<8x64xf32>
    %c0_1 = arith.constant 0 : index
    %c0_2 = arith.constant 0 : index
    %2 = vector.load %arg1[%c0_1, %c0_2] : memref<8x64xf32, #tpu.memory_space<vmem>>, vector<8x64xf32>
    %3 = arith.addf %2, %1 : vector<8x64xf32>
    %c0_3 = arith.constant 0 : index
    %c0_4 = arith.constant 0 : index
    %4 = vector.load %arg3[%c0_3, %c0_4] : memref<8x64xf32, #tpu.memory_space<vmem>>, vector<8x64xf32>
    tpu.vector_store %arg3[%c0_3, %c0_4], %3 {strides = array<i32>} : memref<8x64xf32, #tpu.memory_space<vmem>>, vector<8x64xf32>,
    return
  }
  func.func @transform_0(%arg0: i32) -> (i32, i32) {
    %c0_i32 = arith.constant 0 : i32
    %c0_i32_0 = arith.constant 0 : i32
    return %arg0, %c0_i32 : i32, i32
  }
  func.func @transform_1(%arg0: i32) -> (i32, i32) {
    %c0_i32 = arith.constant 0 : i32
    %c0_i32_0 = arith.constant 0 : i32
    return %arg0, %c0_i32 : i32, i32
  }
  func.func @transform_2(%arg0: i32) -> (i32, i32) {
    %c0_i32 = arith.constant 0 : i32
    %c0_i32_0 = arith.constant 0 : i32
    return %arg0, %c0_i32 : i32, i32
  }
}

</mosaic_0001>

<bundles_post_ra>
// kernel: tpu_custom_call.1
= control target key start
LH: loop header
LB: loop body
LE: loop exit
PB: predicated region body
PF: predicated region fallthrough
CT: control target
= control target key end

     0   :  { %7 = vsyncpa [#allocation3], 0  ;;  %s179_s0 = inlined_call_operand.hbm [shape: f32[8,64], index: 0, kind: input, shape index: {}]   ;;  %s180_s1 = inlined_call_operand.hbm [shape: f32[8,32], index: 1, kind: input, shape index: {}]   ;;  %s181_s2 = inlined_call_operand.hbm [shape: f32[8,64], index: 2, kind: output, shape index: {}]  }
   0x1   :  { %8 = vsyncpa [#allocation6], 0 }
   0x2   :  { %9 = vsyncpa [#allocation4], 0  ;;  %s15_s11 = sshll.u32 %s179_s0, 4  ;;  %s151_s12 = smov [#allocation2]   ;;  %s16_s11 = int_to_ptr.hbm [resolvable:$true] %s15_s11 }
   0x3   :  { %s17_s13 = sshll.u32 %s151_s12, 4  ;;  %s26_s16 = sshll.u32 %s180_s1, 4  ;;  %s18_s13 = int_to_ptr.vmem [resolvable:$true] %s17_s13  ;;  %s27_s16 = int_to_ptr.hbm [resolvable:$true] %s26_s16 }
   0x4   :  { %20 = dma.hbm_to_vmem [thread:$0]  %s16_s11, 128, %s18_s13, [#allocation3]  }
   0x5   :  { %s152_s17 = smov [#allocation5]  }
   0x6   :  { %s28_s18 = sshll.u32 %s152_s17, 4  ;;  %s29_s18 = int_to_ptr.vmem [resolvable:$true] %s28_s18 }
   0x7   :  { %31 = dma.hbm_to_vmem [thread:$0]  %s27_s16, 128, %s29_s18, [#allocation6]  }
   0x8   :  { %145 = dma.done.wait [#allocation3], 128  }
   0x9   :  { %146 = vsyncadd [#allocation3], 4294967168 }
   0xa   :  { %147 = dma.done.wait [#allocation6], 128  }
   0xb   :  { %148 = vsyncadd [#allocation6], 4294967168  ;;  %v40_v0 = vld [vmem:[#allocation5] sm:$0xff]  ;;  %s153_s0 = smov 32   ;;  %vm45_vm0 = vcmask 261120   ;;  %v47_v1 = vld [vmem:[#allocation2] sm:$0xff] }
   0xc   :  { %42 = vrot.lane.b32.xlu0 %v40_v0, %s153_s0  ;;  %s154_s19 = smov [#allocation7]   ;;  %s58_s1 = sshll.u32 %s181_s2, 4  ;;  %vm49_vm1 = vcmask 523264   ;;  %s59_s1 = int_to_ptr.hbm [resolvable:$true] %s58_s1 }
   0xd   :  { %s56_s20 = sshll.u32 %s154_s19, 4  ;;  %s57_s20 = int_to_ptr.vmem [resolvable:$true] %s56_s20 }
  0x7e   :  { %v43_v2 = vpop.permute.xlu0 %42 }
  0x7f   :  { %v46_v3 = vsel %vm45_vm0, %v40_v0, %v43_v2 }
  0x80   :  { %v48_v4 = vadd.f32 %v47_v1, %v46_v3 }
  0x82   :  { %50 = vst.msk [vmem:[#allocation7] sm:$0xff] %vm49_vm1, %v48_v4 }
  0x83   :  { %61 = dma.vmem_to_hbm [thread:$0]  %s57_s20, 128, %s59_s1, [#allocation4]  }
  0x84   :  { %149 = dma.done.wait [#allocation4], 128  }
  0x85   :  { %150 = vsyncadd [#allocation4], 4294967168 }
  0x86   :  { %66 = vsyncpa [#allocation3], 1 }
  0x87   :  { %67 = vsyncpa [#allocation6], 1 }
  0x88   :  { %68 = vsyncpa [#allocation4], 1 }

</bundles_post_ra>
